<compile_context>
chip_gen: v7x
topology: tpu7x:2x2x1
jax: 0.10.0
libtpu: 0.0.40
codegen_flags: <defaults>
</compile_context>

<pallas_src>
import jax
import jax.numpy as jnp
from jax.experimental import pallas as pl
from jax.experimental.pallas import tpu as pltpu

_LANE = 128
_SUBLANE = 8
_EPS = 1e-5


def _round_up(n: int, m: int) -> int:
    return ((n + m - 1) // m) * m


def _pick_class_tile(cp: int) -> int:
    # cp is a multiple of 128; pick the largest convenient tile that divides it.
    for tn in (2048, 1024, 512, 256, 128):
        if cp % tn == 0:
            return tn
    return cp  # unreachable (cp % 128 == 0)


def _fused_two_head_kernel(x1_ref, x2_ref, w1_ref, w2_ref, b1_ref, b2_ref,
                           o1_ref, o2_ref):
    """Fused dual-head classifier with BN pre-folded into the weights.

    x1_ref: [Bp, 768] f32      x2_ref: [Bp, 512] f32    (resident across grid)
    w1_ref: [768, TN] bf16     w2_ref: [512, TN] bf16   (streamed over class dim)
    b1_ref: [1, TN]  f32       b2_ref: [1, TN]  f32
    o1_ref: [Bp, TN] f32       o2_ref: [Bp, TN] f32
    """
    x1 = x1_ref[...].astype(jnp.bfloat16)
    x2 = x2_ref[...].astype(jnp.bfloat16)
    o1_ref[...] = (
        jnp.dot(x1, w1_ref[...], preferred_element_type=jnp.float32)
        + b1_ref[...]
    )
    o2_ref[...] = (
        jnp.dot(x2, w2_ref[...], preferred_element_type=jnp.float32)
        + b2_ref[...]
    )


def fused_classifier(x1, x2, w1, b1, w2, b2, num_classes):
    """Run both classifier heads in a single Pallas call; slice back to C."""
    B, D1 = x1.shape
    _, D2 = x2.shape
    Cp = w1.shape[1]
    assert w2.shape[1] == Cp and Cp % _LANE == 0
    tn = _pick_class_tile(Cp)

    # Pad batch to a sublane multiple (cheap; activations are tiny).
    Bp = _round_up(max(B, 1), _SUBLANE)
    if Bp != B:
        x1 = jnp.zeros((Bp, D1), x1.dtype).at[:B].set(x1)
        x2 = jnp.zeros((Bp, D2), x2.dtype).at[:B].set(x2)

    o1, o2 = pl.pallas_call(
        _fused_two_head_kernel,
        out_shape=(
            jax.ShapeDtypeStruct((Bp, Cp), jnp.float32),
            jax.ShapeDtypeStruct((Bp, Cp), jnp.float32),
        ),
        grid_spec=pltpu.PrefetchScalarGridSpec(
            num_scalar_prefetch=0,
            grid=(Cp // tn,),
            in_specs=[
                pl.BlockSpec((Bp, D1), lambda j: (0, 0)),   # x1 resident
                pl.BlockSpec((Bp, D2), lambda j: (0, 0)),   # x2 resident
                pl.BlockSpec((D1, tn), lambda j: (0, j)),   # w1 streamed over C
                pl.BlockSpec((D2, tn), lambda j: (0, j)),   # w2 streamed over C
                pl.BlockSpec((1, tn), lambda j: (0, j)),    # folded bias 1
                pl.BlockSpec((1, tn), lambda j: (0, j)),    # folded bias 2
            ],
            out_specs=(
                pl.BlockSpec((Bp, tn), lambda j: (0, j)),
                pl.BlockSpec((Bp, tn), lambda j: (0, j)),
            ),
        ),
        compiler_params=pltpu.CompilerParams(
            dimension_semantics=("parallel",),
        ),
    )(x1, x2, w1, w2, b1, b2)
    return o1[:B, :num_classes], o2[:B, :num_classes]


class ClassifierPallas:
    """JAX/Pallas port of the PyTorch `Classifier` module (eval-mode BN)."""

    def __init__(self, classnames: int, key: jax.Array):
        k1, k2 = jax.random.split(key, 2)
        C = int(classnames)
        self.num_classes = C
        Cp = _round_up(C, _LANE)

        # Raw classifier weights in PyTorch layout [C, D], Normal(std=0.001)
        # (weights_init_classifier). Linear has no bias.
        w768_cd = 0.001 * jax.random.normal(k1, (C, 768), jnp.float32)
        w512_cd = 0.001 * jax.random.normal(k2, (C, 512), jnp.float32)
        # Kept in f32 for reference checks.
        self.w768_raw_t = w768_cd.T  # [768, C]
        self.w512_raw_t = w512_cd.T  # [512, C]

        def _fold_bn(w_cd, d):
            # BatchNorm1d after weights_init_kaiming, eval mode:
            #   gamma=1, beta=0, running_mean=0, running_var=1, eps=1e-5.
            gamma = jnp.ones((d,), jnp.float32)
            beta = jnp.zeros((d,), jnp.float32)
            mean = jnp.zeros((d,), jnp.float32)
            var = jnp.ones((d,), jnp.float32)
            s = gamma * jax.lax.rsqrt(var + _EPS)   # per-feature scale
            t = beta - mean * s                     # per-feature shift
            w_dc = w_cd.T * s[:, None]              # [D, C]  BN scale folded
            b_c = t @ w_cd.T                        # [C]     BN shift folded
            # Pad class dim to a lane-dense multiple of 128 (zero columns).
            w_pad = jnp.zeros((d, Cp), jnp.float32).at[:, :C].set(w_dc)
            b_pad = jnp.zeros((1, Cp), jnp.float32).at[0, :C].set(b_c)
            return w_pad.astype(jnp.bfloat16), b_pad

        self.w1, self.b1 = _fold_bn(w768_cd, 768)   # head on 768-d features
        self.w2, self.b2 = _fold_bn(w512_cd, 512)   # head on 512-d features

    def __call__(self, image_features_non_proj, image_features):
        cls_score, cls_score_proj = fused_classifier(
            image_features_non_proj, image_features,
            self.w1, self.b1, self.w2, self.b2, self.num_classes)
        return [cls_score, cls_score_proj]


if __name__ == "__main__":
    key = jax.random.PRNGKey(0)
    k_params, k_x1, k_x2 = jax.random.split(key, 3)

    num_classes = 16
    batch = 8

    model = ClassifierPallas(num_classes, k_params)

    image_features_non_proj = jax.random.normal(k_x1, (batch, 768), jnp.float32)
    image_features = jax.random.normal(k_x2, (batch, 512), jnp.float32)

    cls_score, cls_score_proj = model(image_features_non_proj, image_features)
    jax.block_until_ready((cls_score, cls_score_proj))

    assert cls_score.shape == (batch, num_classes)
    assert cls_score_proj.shape == (batch, num_classes)

    # Tight check: plain-JAX matmul with the exact same folded bf16 weights.
    ref1 = (jnp.dot(image_features_non_proj.astype(jnp.bfloat16), model.w1,
                    preferred_element_type=jnp.float32) + model.b1)[:, :num_classes]
    ref2 = (jnp.dot(image_features.astype(jnp.bfloat16), model.w2,
                    preferred_element_type=jnp.float32) + model.b2)[:, :num_classes]
    assert jnp.allclose(cls_score, ref1, atol=1e-5, rtol=1e-5)
    assert jnp.allclose(cls_score_proj, ref2, atol=1e-5, rtol=1e-5)

    # Semantic check vs the original module in f32: eval-mode BN
    # (scale 1/sqrt(1+eps)) followed by the bias-free classifier.
    sem1 = (image_features_non_proj / jnp.sqrt(1.0 + _EPS)) @ model.w768_raw_t
    sem2 = (image_features / jnp.sqrt(1.0 + _EPS)) @ model.w512_raw_t
    assert jnp.allclose(cls_score, sem1, atol=2e-3, rtol=2e-2)
    assert jnp.allclose(cls_score_proj, sem2, atol=2e-3, rtol=2e-2)

    # Odd batch size exercise (batch-padding path).
    out_a, out_b = model(image_features_non_proj[:3], image_features[:3])
    jax.block_until_ready((out_a, out_b))
    assert out_a.shape == (3, num_classes) and out_b.shape == (3, num_classes)
    assert jnp.allclose(out_a, cls_score[:3], atol=1e-5, rtol=1e-5)
    assert jnp.allclose(out_b, cls_score_proj[:3], atol=1e-5, rtol=1e-5)

    print("KERNEL_OK")
</pallas_src>

<mosaic_0001>
module attributes {stable_mosaic.version = 11 : i64} {
  func.func @_fused_two_head_kernel(%arg0: i32, %arg1: memref<8x768xf32, #tpu.memory_space<vmem>>, %arg2: memref<8x512xf32, #tpu.memory_space<vmem>>, %arg3: memref<768x128xbf16, #tpu.memory_space<vmem>>, %arg4: memref<512x128xbf16, #tpu.memory_space<vmem>>, %arg5: memref<1x128xf32, #tpu.memory_space<vmem>>, %arg6: memref<1x128xf32, #tpu.memory_space<vmem>>, %arg7: memref<8x128xf32, #tpu.memory_space<vmem>>, %arg8: memref<8x128xf32, #tpu.memory_space<vmem>>) attributes {dimension_semantics = [#tpu.dimension_semantics<parallel>], iteration_bounds = array<i64: 1>, scalar_prefetch = 0 : i64, scratch_operands = 0 : i64, tpu.core_type = #tpu.core_type<tc>, window_params = [{pipeline_mode = #tpu.pipeline_mode<synchronous>, transform_indices = @transform_0, window_bounds = array<i64: 8, 768>}, {pipeline_mode = #tpu.pipeline_mode<synchronous>, transform_indices = @transform_1, window_bounds = array<i64: 8, 512>}, {transform_indices = @transform_2, window_bounds = array<i64: 768, 128>}, {transform_indices = @transform_3, window_bounds = array<i64: 512, 128>}, {transform_indices = @transform_4, window_bounds = array<i64: 1, 128>}, {transform_indices = @transform_5, window_bounds = array<i64: 1, 128>}, {transform_indices = @transform_6, window_bounds = array<i64: 8, 128>}, {transform_indices = @transform_7, window_bounds = array<i64: 8, 128>}]} {
    %c0 = arith.constant 0 : index
    %c0_0 = arith.constant 0 : index
    %0 = vector.load %arg1[%c0, %c0_0] : memref<8x768xf32, #tpu.memory_space<vmem>>, vector<8x768xf32>
    %1 = arith.truncf %0 : vector<8x768xf32> to vector<8x768xbf16>
    %c0_1 = arith.constant 0 : index
    %c0_2 = arith.constant 0 : index
    %2 = vector.load %arg2[%c0_1, %c0_2] : memref<8x512xf32, #tpu.memory_space<vmem>>, vector<8x512xf32>
    %3 = arith.truncf %2 : vector<8x512xf32> to vector<8x512xbf16>
    %c0_3 = arith.constant 0 : index
    %c0_4 = arith.constant 0 : index
    %4 = vector.load %arg3[%c0_3, %c0_4] : memref<768x128xbf16, #tpu.memory_space<vmem>>, vector<768x128xbf16>
    %cst = arith.constant dense<0.000000e+00> : vector<8x128xf32>
    %5 = tpu.matmul %1, %4, %cst {dimension_numbers = #tpu.dot_dimension_numbers<[1], [0], [0], [1], [0, 0, 1, 1], [], []>} : vector<8x768xbf16>, vector<768x128xbf16>, vector<8x128xf32> -> vector<8x128xf32>
    %c0_5 = arith.constant 0 : index
    %c0_6 = arith.constant 0 : index
    %6 = vector.load %arg5[%c0_5, %c0_6] : memref<1x128xf32, #tpu.memory_space<vmem>>, vector<1x128xf32>
    %7 = vector.broadcast %6 : vector<1x128xf32> to vector<8x128xf32>
    %8 = arith.addf %5, %7 : vector<8x128xf32>
    %c0_7 = arith.constant 0 : index
    %c0_8 = arith.constant 0 : index
    %9 = vector.load %arg7[%c0_7, %c0_8] : memref<8x128xf32, #tpu.memory_space<vmem>>, vector<8x128xf32>
    tpu.vector_store %arg7[%c0_7, %c0_8], %8 {strides = array<i32>} : memref<8x128xf32, #tpu.memory_space<vmem>>, vector<8x128xf32>,
    %c0_9 = arith.constant 0 : index
    %c0_10 = arith.constant 0 : index
    %10 = vector.load %arg4[%c0_9, %c0_10] : memref<512x128xbf16, #tpu.memory_space<vmem>>, vector<512x128xbf16>
    %cst_11 = arith.constant dense<0.000000e+00> : vector<8x128xf32>
    %11 = tpu.matmul %3, %10, %cst_11 {dimension_numbers = #tpu.dot_dimension_numbers<[1], [0], [0], [1], [0, 0, 1, 1], [], []>} : vector<8x512xbf16>, vector<512x128xbf16>, vector<8x128xf32> -> vector<8x128xf32>
    %c0_12 = arith.constant 0 : index
    %c0_13 = arith.constant 0 : index
    %12 = vector.load %arg6[%c0_12, %c0_13] : memref<1x128xf32, #tpu.memory_space<vmem>>, vector<1x128xf32>
    %13 = vector.broadcast %12 : vector<1x128xf32> to vector<8x128xf32>
    %14 = arith.addf %11, %13 : vector<8x128xf32>
    %c0_14 = arith.constant 0 : index
    %c0_15 = arith.constant 0 : index
    %15 = vector.load %arg8[%c0_14, %c0_15] : memref<8x128xf32, #tpu.memory_space<vmem>>, vector<8x128xf32>
    tpu.vector_store %arg8[%c0_14, %c0_15], %14 {strides = array<i32>} : memref<8x128xf32, #tpu.memory_space<vmem>>, vector<8x128xf32>,
    return
  }
  func.func @transform_0(%arg0: i32) -> (i32, i32) {
    %c0_i32 = arith.constant 0 : i32
    %c0_i32_0 = arith.constant 0 : i32
    %c0_i32_1 = arith.constant 0 : i32
    return %c0_i32, %c0_i32_0 : i32, i32
  }
  func.func @transform_1(%arg0: i32) -> (i32, i32) {
    %c0_i32 = arith.constant 0 : i32
    %c0_i32_0 = arith.constant 0 : i32
    %c0_i32_1 = arith.constant 0 : i32
    return %c0_i32, %c0_i32_0 : i32, i32
  }
  func.func @transform_2(%arg0: i32) -> (i32, i32) {
    %c0_i32 = arith.constant 0 : i32
    %c0_i32_0 = arith.constant 0 : i32
    return %c0_i32, %arg0 : i32, i32
  }
  func.func @transform_3(%arg0: i32) -> (i32, i32) {
    %c0_i32 = arith.constant 0 : i32
    %c0_i32_0 = arith.constant 0 : i32
    return %c0_i32, %arg0 : i32, i32
  }
  func.func @transform_4(%arg0: i32) -> (i32, i32) {
    %c0_i32 = arith.constant 0 : i32
    %c0_i32_0 = arith.constant 0 : i32
    return %c0_i32, %arg0 : i32, i32
  }
  func.func @transform_5(%arg0: i32) -> (i32, i32) {
    %c0_i32 = arith.constant 0 : i32
    %c0_i32_0 = arith.constant 0 : i32
    return %c0_i32, %arg0 : i32, i32
  }
  func.func @transform_6(%arg0: i32) -> (i32, i32) {
    %c0_i32 = arith.constant 0 : i32
    %c0_i32_0 = arith.constant 0 : i32
    return %c0_i32, %arg0 : i32, i32
  }
  func.func @transform_7(%arg0: i32) -> (i32, i32) {
    %c0_i32 = arith.constant 0 : i32
    %c0_i32_0 = arith.constant 0 : i32
    return %c0_i32, %arg0 : i32, i32
  }
}

</mosaic_0001>

<bundles_post_ra>
// kernel: tpu_custom_call.1
= control target key start
LH: loop header
LB: loop body
LE: loop exit
PB: predicated region body
PF: predicated region fallthrough
CT: control target
= control target key end

     0   :  { %13 = vsyncpa [#allocation3], 0  ;;  %s1534_s0 = inlined_call_operand.hbm [shape: f32[8,768], index: 0, kind: input, shape index: {}]   ;;  %s1535_s1 = inlined_call_operand.hbm [shape: f32[8,512], index: 1, kind: input, shape index: {}]   ;;  %s1536_s2 = inlined_call_operand.hbm [shape: bf16[768,128], index: 2, kind: input, shape index: {}]   ;;  %s1537_s3 = inlined_call_operand.hbm [shape: bf16[512,128], index: 3, kind: input, shape index: {}]   ;;  %s1538_s4 = inlined_call_operand.vmem [shape: f32[1,128], index: 4, kind: input, shape index: {}]   ;;  %s1539_s5 = inlined_call_operand.vmem [shape: f32[1,128], index: 5, kind: input, shape index: {}]   ;;  %s1540_s6 = inlined_call_operand.hbm [shape: f32[8,128], index: 6, kind: output, shape index: {0}]   ;;  %s1541_s7 = inlined_call_operand.hbm [shape: f32[8,128], index: 7, kind: output, shape index: {1}]  }
   0x1   :  { %14 = vsyncpa [#allocation6], 0 }
   0x2   :  { %15 = vsyncpa [#allocation9], 0 }
   0x3   :  { %16 = vsyncpa [#allocation4], 0 }
   0x4   :  { %17 = vsyncpa [#allocation12], 0  ;;  %s1408_s24 = smov [#allocation5]   ;;  %s1409_s26 = smov [#allocation2]  }
   0x5   :  { %s34_s25 = sshll.u32 %s1408_s24, 4  ;;  %s24_s27 = sshll.u32 %s1409_s26, 4  ;;  %s35_s25 = int_to_ptr.vmem [resolvable:$true] %s34_s25  ;;  %s25_s27 = int_to_ptr.vmem [resolvable:$true] %s24_s27 }
   0x6   :  { %s1266_s30 = scalar_lea.hbm %s1535_s1, 512 }
   0x7   :  { %p1267_p0 = scmp.ne.s32.totalorder %s1535_s1, %s1266_s30  ;;  %p1270_p1 = scmp.lt.u32.totalorder %s1266_s30, %s1535_s1 }
   0x9   :  { %p1272_p2 = pnand %p1270_p1, %p1267_p0 }
   0xb   :  { %1275 = shalt.err (!%p1272_p2)
}
   0xc   :  { %s1276_s12 = scalar_lea.vmem %s35_s25, 512  ;;  %p1281_p4 = scmp.lt.s32.totalorder %s35_s25, %s35_s25 }
   0xd   :  { %p1277_p3 = scmp.ne.s32.totalorder %s35_s25, %s1276_s12  ;;  %p1282_p5 = scmp.lt.s32.totalorder %s1276_s12, %s1276_s12 }
   0xf   :  { %p1283_p6 = por %p1282_p5, %p1281_p4 }
  0x11   :  { %p1284_p7 = pnand %p1283_p6, %p1277_p3 }
  0x13   :  { %1287 = shalt.err (!%p1284_p7)
}
  0x14   :  { %37 = dma.hbm_to_vmem [thread:$0]  %s1535_s1, 512, %s35_s25, [#allocation6]  }
  0x15   :  { %s1288_s17 = scalar_lea.hbm %s1534_s0, 768 }
  0x16   :  { %p1289_p8 = scmp.ne.s32.totalorder %s1534_s0, %s1288_s17  ;;  %p1292_p9 = scmp.lt.u32.totalorder %s1288_s17, %s1534_s0 }
  0x18   :  { %p1294_p10 = pnand %p1292_p9, %p1289_p8 }
  0x1a   :  { %1297 = shalt.err (!%p1294_p10)
}
  0x1b   :  { %s1298_s22 = scalar_lea.vmem %s25_s27, 768  ;;  %p1303_p12 = scmp.lt.s32.totalorder %s25_s27, %s25_s27 }
  0x1c   :  { %p1299_p11 = scmp.ne.s32.totalorder %s25_s27, %s1298_s22  ;;  %p1304_p13 = scmp.lt.s32.totalorder %s1298_s22, %s1298_s22 }
  0x1e   :  { %p1305_p0 = por %p1304_p13, %p1303_p12 }
  0x20   :  { %p1306_p1 = pnand %p1305_p0, %p1299_p11 }
  0x22   :  { %1309 = shalt.err (!%p1306_p1)
}
  0x23   :  { %27 = dma.hbm_to_vmem [thread:$0]  %s1534_s0, 768, %s25_s27, [#allocation3]  }
  0x24   :  { %s1410_s24 = smov [#allocation7]   ;;  %s1310_s29 = scalar_lea.hbm %s1536_s2, 6144 }
  0x25   :  { %s43_s25 = sshll.u32 %s1410_s24, 4  ;;  %p1311_p2 = scmp.ne.s32.totalorder %s1536_s2, %s1310_s29  ;;  %s44_s25 = int_to_ptr.vmem [resolvable:$true] %s43_s25 }
  0x26   :  { %p1314_p3 = scmp.lt.u32.totalorder %s1310_s29, %s1536_s2 }
  0x28   :  { %p1316_p4 = pnand %p1314_p3, %p1311_p2 }
  0x2a   :  { %1319 = shalt.err (!%p1316_p4)
}
  0x2b   :  { %s1320_s11 = scalar_lea.vmem %s44_s25, 6144  ;;  %p1325_p6 = scmp.lt.s32.totalorder %s44_s25, %s44_s25 }
  0x2c   :  { %p1321_p5 = scmp.ne.s32.totalorder %s44_s25, %s1320_s11  ;;  %p1326_p7 = scmp.lt.s32.totalorder %s1320_s11, %s1320_s11 }
  0x2e   :  { %p1327_p8 = por %p1326_p7, %p1325_p6 }
  0x30   :  { %p1328_p9 = pnand %p1327_p8, %p1321_p5 }
  0x32   :  { %1331 = shalt.err (!%p1328_p9)
}
  0x33   :  { %s1411_s0 = smov 64   ;;  %s1412_s27 = smov 4  }
  0x34   :  { %49 = dma.hbm_to_vmem [thread:$0]  %s1536_s2, 6144, %s44_s25, [#allocation6], %s1411_s0, %s1411_s0, %s1412_s27  }
  0x35   :  { %s1413_s14 = smov [#allocation8]   ;;  %s1332_s18 = scalar_lea.hbm %s1537_s3, 4096 }
  0x36   :  { %s55_s15 = sshll.u32 %s1413_s14, 4  ;;  %p1333_p10 = scmp.ne.s32.totalorder %s1537_s3, %s1332_s18  ;;  %s56_s15 = int_to_ptr.vmem [resolvable:$true] %s55_s15 }
  0x37   :  { %p1336_p11 = scmp.lt.u32.totalorder %s1332_s18, %s1537_s3 }
  0x39   :  { %p1338_p12 = pnand %p1336_p11, %p1333_p10 }
  0x3b   :  { %1341 = shalt.err (!%p1338_p12)
}
  0x3c   :  { %s1342_s1 = scalar_lea.vmem %s56_s15, 4096  ;;  %p1347_p0 = scmp.lt.s32.totalorder %s56_s15, %s56_s15 }
  0x3d   :  { %p1343_p13 = scmp.ne.s32.totalorder %s56_s15, %s1342_s1  ;;  %p1348_p1 = scmp.lt.s32.totalorder %s1342_s1, %s1342_s1 }
  0x3f   :  { %p1349_p2 = por %p1348_p1, %p1347_p0 }
  0x41   :  { %p1350_p3 = pnand %p1349_p2, %p1343_p13 }
  0x43   :  { %1353 = shalt.err (!%p1350_p3)
}
  0x44   :  { %61 = dma.hbm_to_vmem [thread:$0]  %s1537_s3, 4096, %s56_s15, [#allocation9], %s1411_s0, %s1411_s0, %s1412_s27  }
  0x45   :  { %1398 = dma.done.wait [#allocation3], 768  }
  0x46   :  { %1399 = vsyncadd [#allocation3], 4294966528 }
  0x47   :  { %1400 = dma.done.wait [#allocation6], 6656  }
  0x48   :  { %1401 = vsyncadd [#allocation6], 4294960640 }
  0x49   :  { %1402 = dma.done.wait [#allocation9], 4096  }
  0x4a   :  { %1403 = vsyncadd [#allocation9], 4294963200  ;;  %v1186_v0 = vld [vmem:[#allocation7 + $0x40] sm:$0xff]   ;;  %v1190_v4 = vld [vmem:[#allocation7 + $0x48] sm:$0xff]   ;;  %s1414_s25 = smov [#allocation10]  }
  0x4b   :  { %v1187_v1 = vld [vmem:[#allocation7] sm:$0xff]   ;;  %1068 = vmatprep.subr.bf16.mxu0 %v1186_v0  ;;  %v1191_v5 = vld [vmem:[#allocation7 + $0x8] sm:$0xff]   ;;  %v1194_v8 = vld [vmem:[#allocation7 + $0x50] sm:$0xff]   ;;  %s961_s26 = sshll.u32 %s1414_s25, 4  ;;  %s962_s26 = int_to_ptr.vmem [resolvable:$true] %s961_s26 }
  0x4c   :  { %v1188_v2 = vld [vmem:[#allocation7 + $0xc0] sm:$0xff]   ;;  %1069 = vmatpush3.bf16.msra.mxu0 %v1187_v1  ;;  %v1192_v6 = vld [vmem:[#allocation7 + $0xc8] sm:$0xff]   ;;  %v1195_v9 = vld [vmem:[#allocation7 + $0x10] sm:$0xff]   ;;  %p1359_p5 = scmp.lt.s32.totalorder %s962_s26, %s962_s26 }
  0x4d   :  { %v1189_v3 = vld [vmem:[#allocation7 + $0x80] sm:$0xff]   ;;  %1090 = vmatprep.subr.bf16.mxu1 %v1188_v2  ;;  %1070 = vmatprep.subr.bf16.mxu0 %v1190_v4  ;;  %v1193_v7 = vld [vmem:[#allocation7 + $0x88] sm:$0xff]   ;;  %v1196_v10 = vld [vmem:[#allocation7 + $0xd0] sm:$0xff]  }
  0x4e   :  { %1091 = vmatpush3.bf16.msra.mxu1 %v1189_v3  ;;  %v1197_v11 = vld [vmem:[#allocation7 + $0x90] sm:$0xff]   ;;  %v1198_v12 = vld [vmem:[#allocation7 + $0x58] sm:$0xff]   ;;  %v1202_v16 = vld [vmem:[#allocation7 + $0x60] sm:$0xff]  }
  0x4f   :  { %1092 = vmatprep.subr.bf16.mxu1 %v1192_v6  ;;  %v1199_v13 = vld [vmem:[#allocation7 + $0x18] sm:$0xff]   ;;  %v1203_v17 = vld [vmem:[#allocation7 + $0x20] sm:$0xff]   ;;  %v1206_v20 = vld [vmem:[#allocation7 + $0x68] sm:$0xff]  }
  0x50   :  { %1071 = vmatpush3.bf16.msra.mxu0 %v1191_v5  ;;  %v1200_v14 = vld [vmem:[#allocation7 + $0xd8] sm:$0xff]   ;;  %v1204_v18 = vld [vmem:[#allocation7 + $0xe0] sm:$0xff]   ;;  %v1207_v21 = vld [vmem:[#allocation7 + $0x28] sm:$0xff]  }
  0x51   :  { %1072 = vmatprep.subr.bf16.mxu0 %v1194_v8  ;;  %v1201_v15 = vld [vmem:[#allocation7 + $0x98] sm:$0xff]   ;;  %v1205_v19 = vld [vmem:[#allocation7 + $0xa0] sm:$0xff]   ;;  %v1208_v22 = vld [vmem:[#allocation7 + $0xe8] sm:$0xff]  }
  0x52   :  { %1093 = vmatpush3.bf16.msra.mxu1 %v1193_v7  ;;  %v1209_v23 = vld [vmem:[#allocation7 + $0xa8] sm:$0xff]   ;;  %v1210_v24 = vld [vmem:[#allocation7 + $0x70] sm:$0xff]   ;;  %v1214_v28 = vld [vmem:[#allocation7 + $0x78] sm:$0xff]  }
  0x53   :  { %1094 = vmatprep.subr.bf16.mxu1 %v1196_v10  ;;  %v1211_v25 = vld [vmem:[#allocation7 + $0x30] sm:$0xff]   ;;  %v1215_v29 = vld [vmem:[#allocation7 + $0x38] sm:$0xff]   ;;  %v1218_v36 = vld [vmem:[#allocation7 + $0x140] sm:$0xff]  }
  0x54   :  { %1073 = vmatpush3.bf16.msra.mxu0 %v1195_v9  ;;  %v1212_v26 = vld [vmem:[#allocation7 + $0xf0] sm:$0xff]   ;;  %v1216_v30 = vld [vmem:[#allocation7 + $0xf8] sm:$0xff]   ;;  %v82_v37 = vld [vmem:[#allocation2 + $0x18] sm:$0xff] }
  0x55   :  { %1074 = vmatprep.subr.bf16.mxu0 %v1198_v12  ;;  %v1213_v27 = vld [vmem:[#allocation7 + $0xb0] sm:$0xff]   ;;  %v80_v31 = vld [vmem:[#allocation2 + $0x8] sm:$0xff]  ;;  %v88_v38 = vpack.c.bf16 %v82_v37, %v82_v37  ;;  %v1219_v39 = vld [vmem:[#allocation7 + $0x100] sm:$0xff]  }
  0x56   :  { %1095 = vmatpush3.bf16.msra.mxu1 %v1197_v11  ;;  %v86_v32 = vpack.c.bf16 %v80_v31, %v80_v31  ;;  %v1217_v33 = vld [vmem:[#allocation7 + $0xb8] sm:$0xff]   ;;  %v79_v34 = vld [vmem:[#allocation2] sm:$0xff]  ;;  %v81_v40 = vld [vmem:[#allocation2 + $0x10] sm:$0xff] }
  0x57   :  { %1096 = vmatprep.subr.bf16.mxu1 %v1200_v14  ;;  %v85_v35 = vpack.c.bf16 %v79_v34, %v79_v34  ;;  %562 = vmatprep.mubr.bf16.mxu1 %v88_v38  ;;  %v87_v41 = vpack.c.bf16 %v81_v40, %v81_v40  ;;  %v1220_v42 = vld [vmem:[#allocation7 + $0x148] sm:$0xff]   ;;  %v1222_v44 = vld [vmem:[#allocation7 + $0x150] sm:$0xff]   ;;  %v1224_v46 = vld [vmem:[#allocation7 + $0x158] sm:$0xff]  }
  0x58   :  { %1075 = vmatpush3.bf16.msra.mxu0 %v1199_v13  ;;  %522 = vmatprep.mubr.bf16.mxu0 %v86_v32  ;;  %v1221_v43 = vld [vmem:[#allocation7 + $0x108] sm:$0xff]   ;;  %v1223_v45 = vld [vmem:[#allocation7 + $0x110] sm:$0xff]   ;;  %v1225_v47 = vld [vmem:[#allocation7 + $0x118] sm:$0xff]  }
  0x59   :  { %1076 = vmatprep.subr.bf16.mxu0 %v1202_v16  ;;  %v1226_v48 = vld [vmem:[#allocation7 + $0x160] sm:$0xff]   ;;  %v1228_v51 = vld [vmem:[#allocation7 + $0x168] sm:$0xff]   ;;  %v84_v54 = vld [vmem:[#allocation2 + $0x28] sm:$0xff] }
  0x5a   :  { %1097 = vmatpush3.bf16.msra.mxu1 %v1201_v15  ;;  %v1227_v49 = vld [vmem:[#allocation7 + $0x120] sm:$0xff]   ;;  %v1229_v53 = vld [vmem:[#allocation7 + $0x128] sm:$0xff]   ;;  %v1230_v55 = vld [vmem:[#allocation7 + $0x170] sm:$0xff]   ;;  %v90_v56 = vpack.c.bf16 %v84_v54, %v84_v54 }
  0x5b   :  { %1098 = vmatprep.subr.bf16.mxu1 %v1204_v18  ;;  %v1232_v50 = vld [vmem:[#allocation8 + $0x40] sm:$0xff]   ;;  %v1236_v57 = vld [vmem:[#allocation8 + $0x48] sm:$0xff]   ;;  %v1231_v59 = vld [vmem:[#allocation7 + $0x130] sm:$0xff]  }
  0x5c   :  { %1077 = vmatpush3.bf16.msra.mxu0 %v1203_v17  ;;  %v1234_v52 = vld [vmem:[#allocation8] sm:$0xff]   ;;  %v1237_v58 = vld [vmem:[#allocation8 + $0x8] sm:$0xff]   ;;  %v1233_v60 = vld [vmem:[#allocation7 + $0x178] sm:$0xff]  }
  0x5d   :  { %1078 = vmatprep.subr.bf16.mxu0 %v1206_v20  ;;  %v1240_v61 = vld [vmem:[#allocation8 + $0x50] sm:$0xff]   ;;  %v1235_v63 = vld [vmem:[#allocation7 + $0x138] sm:$0xff]   ;;  %v1238_v1 = vld [vmem:[#allocation8 + $0xc0] sm:$0xff]  }
  0x5e   :  { %1099 = vmatpush3.bf16.msra.mxu1 %v1205_v19  ;;  %v1241_v62 = vld [vmem:[#allocation8 + $0x10] sm:$0xff]   ;;  %v1244_v2 = vld [vmem:[#allocation8 + $0x58] sm:$0xff]   ;;  %v1239_v4 = vld [vmem:[#allocation8 + $0x80] sm:$0xff]  }
  0x5f   :  { %1100 = vmatprep.subr.bf16.mxu1 %v1208_v22  ;;  %v83_v0 = vld [vmem:[#allocation2 + $0x20] sm:$0xff]  ;;  %v1245_v3 = vld [vmem:[#allocation8 + $0x18] sm:$0xff]   ;;  %v1242_v6 = vld [vmem:[#allocation8 + $0xc8] sm:$0xff]  }
  0x60   :  { %1079 = vmatpush3.bf16.msra.mxu0 %v1207_v21  ;;  %v89_v5 = vpack.c.bf16 %v83_v0, %v83_v0  ;;  %v1248_v7 = vld [vmem:[#allocation8 + $0x60] sm:$0xff]   ;;  %v1243_v9 = vld [vmem:[#allocation8 + $0x88] sm:$0xff]   ;;  %v1246_v10 = vld [vmem:[#allocation8 + $0xd0] sm:$0xff]  }
  0x61   :  { %1080 = vmatprep.subr.bf16.mxu0 %v1210_v24  ;;  %v1249_v8 = vld [vmem:[#allocation8 + $0x20] sm:$0xff]   ;;  %v1252_v11 = vld [vmem:[#allocation8 + $0x68] sm:$0xff]   ;;  %v1247_v13 = vld [vmem:[#allocation8 + $0x90] sm:$0xff]  }
  0x62   :  { %1101 = vmatpush3.bf16.msra.mxu1 %v1209_v23  ;;  %v1253_v12 = vld [vmem:[#allocation8 + $0x28] sm:$0xff]   ;;  %v1250_v14 = vld [vmem:[#allocation8 + $0xd8] sm:$0xff]   ;;  %v1256_v15 = vld [vmem:[#allocation8 + $0x70] sm:$0xff]  }
  0x63   :  { %1102 = vmatprep.subr.bf16.mxu1 %v1212_v26  ;;  %v1257_v16 = vld [vmem:[#allocation8 + $0x30] sm:$0xff]   ;;  %v1251_v17 = vld [vmem:[#allocation8 + $0x98] sm:$0xff]   ;;  %v1254_v18 = vld [vmem:[#allocation8 + $0xe0] sm:$0xff]  }
  0x64   :  { %1081 = vmatpush3.bf16.msra.mxu0 %v1211_v25  ;;  %v1260_v19 = vld [vmem:[#allocation8 + $0x78] sm:$0xff]   ;;  %v1255_v21 = vld [vmem:[#allocation8 + $0xa0] sm:$0xff]   ;;  %v92_v22 = vld [vmem:[#allocation5 + $0x8] sm:$0xff] }
  0x65   :  { %1082 = vmatprep.subr.bf16.mxu0 %v1214_v28  ;;  %v1261_v20 = vld [vmem:[#allocation8 + $0x38] sm:$0xff]   ;;  %v91_v23 = vld [vmem:[#allocation5] sm:$0xff]  ;;  %v1258_v24 = vld [vmem:[#allocation8 + $0xe8] sm:$0xff]   ;;  %v96_v25 = vpack.c.bf16 %v92_v22, %v92_v22 }
  0x66   :  { %1103 = vmatpush3.bf16.msra.mxu1 %v1213_v27  ;;  %v95_v26 = vpack.c.bf16 %v91_v23, %v91_v23  ;;  %v94_v27 = vld [vmem:[#allocation5 + $0x18] sm:$0xff]  ;;  %v1263_v31 = vld [vmem:[#allocation8 + $0xb0] sm:$0xff]  }
  0x67   :  { %1104 = vmatprep.subr.bf16.mxu1 %v1216_v30  ;;  %v98_v28 = vpack.c.bf16 %v94_v27, %v94_v27  ;;  %v1262_v30 = vld [vmem:[#allocation8 + $0xf0] sm:$0xff]   ;;  %v1264_v32 = vld [vmem:[#allocation8 + $0xf8] sm:$0xff]  }
  0x68   :  { %1083 = vmatpush3.bf16.msra.mxu0 %v1215_v29  ;;  %v1259_v29 = vld [vmem:[#allocation8 + $0xa8] sm:$0xff]   ;;  %v93_v34 = vld [vmem:[#allocation5 + $0x10] sm:$0xff] }
  0x69   :  { %1112 = vmatprep.subr.bf16.mxu0 %v1218_v36  ;;  %v986_v37 = vld [vmem:[%s1538_s4] ss:$0 sm:$0xff]  ;;  %s1354_s4 = scalar_lea.vmem %s962_s26, 128 }
  0x6a   :  { %1105 = vmatpush3.bf16.msra.mxu1 %v1217_v33  ;;  %v1265_v33 = vld [vmem:[#allocation8 + $0xb8] sm:$0xff]   ;;  %p1355_p4 = scmp.ne.s32.totalorder %s962_s26, %s1354_s4  ;;  %p1360_p6 = scmp.lt.s32.totalorder %s1354_s4, %s1354_s4 }
  0x6b   :  { %523 = vmatmul.mubr.bf16.vlgmr.msra.gmra.mrb[0].mxu0 %v85_v35  ;;  %1134 = vmatprep.subr.bf16.mxu1 %v1232_v50  ;;  %v97_v35 = vpack.c.bf16 %v93_v34, %v93_v34 }
  0x6c   :  { %1113 = vmatpush3.bf16.msra.mxu0 %v1219_v39  ;;  %602 = vmatprep.mubr.bf16.mxu0 %v90_v56  ;;  %p1361_p7 = por %p1360_p6, %p1359_p5 }
  0x6d   :  { %563 = vmatmul.mubr.bf16.vlgmr.msra.gmra.mrb[0].mxu1 %v87_v41  ;;  %1114 = vmatprep.subr.bf16.mxu0 %v1220_v42 }
  0x6e   :  { %1135 = vmatpush3.bf16.msra.mxu1 %v1234_v52  ;;  %906 = vmatprep.mubr.bf16.mxu1 %v96_v25  ;;  %p1362_p8 = pnand %p1361_p7, %p1355_p4 }
  0x6f   :  { %1136 = vmatprep.subr.bf16.mxu1 %v1236_v57 }
  0x70   :  { %1115 = vmatpush3.bf16.msra.mxu0 %v1221_v43 }
  0x71   :  { %1116 = vmatprep.subr.bf16.mxu0 %v1222_v44 }
  0x72   :  { %1137 = vmatpush3.bf16.msra.mxu1 %v1237_v58 }
  0x73   :  { %1138 = vmatprep.subr.bf16.mxu1 %v1240_v61 }
  0x74   :  { %1117 = vmatpush3.bf16.msra.mxu0 %v1223_v45 }
  0x75   :  { %1118 = vmatprep.subr.bf16.mxu0 %v1224_v46 }
  0x76   :  { %1139 = vmatpush3.bf16.msra.mxu1 %v1241_v62 }
  0x77   :  { %1140 = vmatprep.subr.bf16.mxu1 %v1244_v2 }
  0x78   :  { %1119 = vmatpush3.bf16.msra.mxu0 %v1225_v47 }
  0x79   :  { %1120 = vmatprep.subr.bf16.mxu0 %v1226_v48 }
  0x7a   :  { %1141 = vmatpush3.bf16.msra.mxu1 %v1245_v3 }
  0x7b   :  { %1142 = vmatprep.subr.bf16.mxu1 %v1248_v7 }
  0x7c   :  { %1121 = vmatpush3.bf16.msra.mxu0 %v1227_v49 }
  0x7d   :  { %1122 = vmatprep.subr.bf16.mxu0 %v1228_v51 }
  0x7e   :  { %1143 = vmatpush3.bf16.msra.mxu1 %v1249_v8 }
  0x7f   :  { %1144 = vmatprep.subr.bf16.mxu1 %v1252_v11 }
  0x80   :  { %1123 = vmatpush3.bf16.msra.mxu0 %v1229_v53 }
  0x81   :  { %1124 = vmatprep.subr.bf16.mxu0 %v1230_v55 }
  0x82   :  { %1145 = vmatpush3.bf16.msra.mxu1 %v1253_v12 }
  0x83   :  { %1146 = vmatprep.subr.bf16.mxu1 %v1256_v15 }
  0x84   :  { %1125 = vmatpush3.bf16.msra.mxu0 %v1231_v59 }
  0x85   :  { %1126 = vmatprep.subr.bf16.mxu0 %v1233_v60 }
  0x86   :  { %1147 = vmatpush3.bf16.msra.mxu1 %v1257_v16 }
  0x87   :  { %1148 = vmatprep.subr.bf16.mxu1 %v1260_v19 }
  0x88   :  { %1127 = vmatpush3.bf16.msra.mxu0 %v1235_v63 }
  0x89   :  { %1156 = vmatprep.subr.bf16.mxu0 %v1238_v1 }
  0x8a   :  { %1149 = vmatpush3.bf16.msra.mxu1 %v1261_v20 }
  0x8b   :  { %603 = vmatmul.mubr.bf16.vlgmr.msra.gmra.mrb[4].mxu0 %v89_v5 }
  0x8c   :  { %1157 = vmatpush3.bf16.msra.mxu0 %v1239_v4  ;;  %946 = vmatprep.mubr.bf16.mxu0 %v98_v28 }
  0x8d   :  { %1158 = vmatprep.subr.bf16.mxu0 %v1242_v6  ;;  %907 = vmatmul.mubr.bf16.vlgmr.msra.gmra.mrb[4].mxu1 %v95_v26 }
  0x90   :  { %1159 = vmatpush3.bf16.msra.mxu0 %v1243_v9 }
  0x91   :  { %1160 = vmatprep.subr.bf16.mxu0 %v1246_v10 }
  0x94   :  { %1161 = vmatpush3.bf16.msra.mxu0 %v1247_v13 }
  0x95   :  { %1162 = vmatprep.subr.bf16.mxu0 %v1250_v14 }
  0x98   :  { %1163 = vmatpush3.bf16.msra.mxu0 %v1251_v17 }
  0x99   :  { %1164 = vmatprep.subr.bf16.mxu0 %v1254_v18 }
  0x9c   :  { %1165 = vmatpush3.bf16.msra.mxu0 %v1255_v21 }
  0x9d   :  { %1166 = vmatprep.subr.bf16.mxu0 %v1258_v24 }
  0xa0   :  { %1167 = vmatpush3.bf16.msra.mxu0 %v1259_v29 }
  0xa1   :  { %1168 = vmatprep.subr.bf16.mxu0 %v1262_v30 }
  0xa4   :  { %1169 = vmatpush3.bf16.msra.mxu0 %v1263_v31 }
  0xa5   :  { %1170 = vmatprep.subr.bf16.mxu0 %v1264_v32 }
  0xa8   :  { %1171 = vmatpush3.bf16.msra.mxu0 %v1265_v33 }
  0xab   :  { %947 = vmatmul.mubr.bf16.vlgmr.msra.gmra.mrb[8].mxu0 %v97_v35 }
 0x13e   :  { %v1084_v36 = vpop.f32.mrb[0].mxu0 }
 0x13f   :  { %v1085_v38 = vpop.f32.mrb[1].mxu0 }
 0x140   :  { %v1086_v39 = vadd.f32 %v1085_v38, %v1084_v36  ;;  %v1087_v40 = vpop.f32.mrb[2].mxu0  ;;  %v1106_v41 = vpop.f32.mrb[0].mxu1 }
 0x141   :  { %v1088_v42 = vpop.f32.mrb[3].mxu0  ;;  %v1107_v44 = vpop.f32.mrb[1].mxu1 }
 0x142   :  { %v525_v43 = vadd.f32 %v1086_v39, %v986_v37  ;;  %v1108_v45 = vadd.f32 %v1107_v44, %v1106_v41  ;;  %v1109_v46 = vpop.f32.mrb[2].mxu1 }
 0x143   :  { %v1110_v47 = vpop.f32.mrb[3].mxu1 }
 0x144   :  { %v565_v48 = vadd.f32 %v1108_v45, %v525_v43 }
 0x15e   :  { %v1128_v49 = vpop.f32.mrb[4].mxu0 }
 0x15f   :  { %v1129_v50 = vpop.f32.mrb[5].mxu0 }
 0x160   :  { %v1130_v51 = vadd.f32 %v1129_v50, %v1128_v49  ;;  %v1131_v52 = vpop.f32.mrb[6].mxu0 }
 0x161   :  { %v1132_v53 = vpop.f32.mrb[7].mxu0 }
 0x162   :  { %v605_v54 = vadd.f32 %v1130_v51, %v565_v48 }
 0x164   :  { %610 = vst [vmem:[#allocation10] sm:$0xff] %v605_v54 }
 0x165   :  { %1365 = shalt.err (!%p1362_p8)
}
 0x166   :  { %s1366_s30 = scalar_lea.hbm %s1540_s6, 128 }
 0x167   :  { %p1367_p9 = scmp.ne.s32.totalorder %s1540_s6, %s1366_s30  ;;  %p1370_p10 = scmp.lt.u32.totalorder %s1366_s30, %s1540_s6 }
 0x169   :  { %p1372_p11 = pnand %p1370_p10, %p1367_p9 }
 0x16b   :  { %1375 = shalt.err (!%p1372_p11)
}
 0x16c   :  { %964 = dma.vmem_to_hbm [thread:$0]  %s962_s26, 128, %s1540_s6, [#allocation4]   ;;  %v1150_v55 = vpop.f32.mrb[4].mxu1  ;;  %v1035_v60 = vld [vmem:[%s1539_s5] ss:$0 sm:$0xff] }
 0x16d   :  { %v1151_v56 = vpop.f32.mrb[5].mxu1  ;;  %s1415_s14 = smov [#allocation11]  }
 0x16e   :  { %v1152_v57 = vadd.f32 %v1151_v56, %v1150_v55  ;;  %v1153_v58 = vpop.f32.mrb[6].mxu1  ;;  %s971_s15 = sshll.u32 %s1415_s14, 4  ;;  %s972_s15 = int_to_ptr.vmem [resolvable:$true] %s971_s15 }
 0x16f   :  { %v1154_v59 = vpop.f32.mrb[7].mxu1  ;;  %s1376_s6 = scalar_lea.vmem %s972_s15, 128  ;;  %p1381_p13 = scmp.lt.s32.totalorder %s972_s15, %s972_s15 }
 0x170   :  { %v909_v61 = vadd.f32 %v1152_v57, %v1035_v60  ;;  %p1377_p12 = scmp.ne.s32.totalorder %s972_s15, %s1376_s6  ;;  %p1382_p0 = scmp.lt.s32.totalorder %s1376_s6, %s1376_s6 }
 0x172   :  { %p1383_p1 = por %p1382_p0, %p1381_p13 }
 0x174   :  { %p1384_p2 = pnand %p1383_p1, %p1377_p12 }
 0x17e   :  { %v1172_v62 = vpop.f32.mrb[8].mxu0 }
 0x17f   :  { %v1173_v63 = vpop.f32.mrb[9].mxu0 }
 0x180   :  { %v1174_v0 = vadd.f32 %v1173_v63, %v1172_v62  ;;  %v1175_v1 = vpop.f32.mrb[10].mxu0 }
 0x181   :  { %v1176_v2 = vpop.f32.mrb[11].mxu0 }
 0x182   :  { %v949_v3 = vadd.f32 %v1174_v0, %v909_v61 }
 0x184   :  { %954 = vst [vmem:[#allocation11] sm:$0xff] %v949_v3 }
 0x185   :  { %1387 = shalt.err (!%p1384_p2)
}
 0x186   :  { %s1388_s17 = scalar_lea.hbm %s1541_s7, 128 }
 0x187   :  { %p1389_p3 = scmp.ne.s32.totalorder %s1541_s7, %s1388_s17  ;;  %p1392_p4 = scmp.lt.u32.totalorder %s1388_s17, %s1541_s7 }
 0x189   :  { %p1394_p5 = pnand %p1392_p4, %p1389_p3 }
 0x18b   :  { %1397 = shalt.err (!%p1394_p5)
}
 0x18c   :  { %974 = dma.vmem_to_hbm [thread:$0]  %s972_s15, 128, %s1541_s7, [#allocation12]  }
 0x18d   :  { %1404 = dma.done.wait [#allocation4], 128  }
 0x18e   :  { %1405 = vsyncadd [#allocation4], 4294967168 }
 0x18f   :  { %1406 = dma.done.wait [#allocation12], 128  }
 0x190   :  { %1407 = vsyncadd [#allocation12], 4294967168 }
 0x191   :  { %981 = vsyncpa [#allocation3], 1 }
 0x192   :  { %982 = vsyncpa [#allocation6], 1 }
 0x193   :  { %983 = vsyncpa [#allocation9], 1 }
 0x194   :  { %984 = vsyncpa [#allocation4], 1 }
 0x195   :  { %985 = vsyncpa [#allocation12], 1 }

</bundles_post_ra>
